<compile_context>
chip_gen: v7x
topology: tpu7x:2x2x1
jax: 0.10.0
libtpu: 0.0.40
codegen_flags: <defaults>
</compile_context>

<pallas_src>
import functools

import jax
import jax.numpy as jnp
from jax.experimental import pallas as pl
from jax.experimental.pallas import tpu as pltpu


def _round_up(x, m):
    return ((x + m - 1) // m) * m


# ---------------------------------------------------------------------------
# Kernel
# ---------------------------------------------------------------------------
def critic_kernel(s_ref, a_ref, w1_ref, w2_ref, b_ref, wo_ref, bo_ref, out_ref):
    # Two small-K MXU matmuls (K = state_dim / action_dim), fused bias + ReLU.
    h = jnp.dot(s_ref[...], w1_ref[...], preferred_element_type=jnp.float32)
    h = h + jnp.dot(a_ref[...], w2_ref[...], preferred_element_type=jnp.float32)
    h = jnp.maximum(h + b_ref[...], 0.0)                       # [tile_b, H_pad] f32
    # Output unit: single-column MXU matmul (padded hidden cols are zero in both
    # h and wo, so they drop out). No cross-lane reduce, no relayout.
    q = jnp.dot(h, wo_ref[...], preferred_element_type=jnp.float32) + bo_ref[...]
    out_ref[...] = q.astype(out_ref.dtype)                     # [tile_b, 1]


# ---------------------------------------------------------------------------
# Parameter prep (run ONCE, reuse across forward calls)
# ---------------------------------------------------------------------------
def prepare_critic_params(params, *, compute_dtype=jnp.float32):
    """Pad / fuse the raw params into the kernel-ready layout.

    Raw params: (w1 [S,H], b1 [1,H], w2 [A,H], b2 [1,H], wo [H,1], bo [1,1]).
    Returns (w1_pad, w2_pad, b12_pad, wo_col, bo) with hidden width padded to 128.
    """
    w1, b1, w2, b2, wo, bo = params
    n_layer = w1.shape[1]
    H_pad = _round_up(n_layer, 128)
    pad_h = H_pad - n_layer

    w1p = jnp.pad(w1, ((0, 0), (0, pad_h))).astype(compute_dtype)     # [S, H_pad]
    w2p = jnp.pad(w2, ((0, 0), (0, pad_h))).astype(compute_dtype)     # [A, H_pad]
    b12 = jnp.pad((b1 + b2).reshape(1, n_layer), ((0, 0), (0, pad_h))).astype(jnp.float32)
    woc = jnp.pad(wo.reshape(n_layer, 1), ((0, pad_h), (0, 0))).astype(jnp.float32)
    bo2 = bo.reshape(1, 1).astype(jnp.float32)
    return (w1p, w2p, b12, woc, bo2)


# ---------------------------------------------------------------------------
# Tiling selection
# ---------------------------------------------------------------------------
def _choose_tiling(B, tile_b=None, max_tile=8192):
    """Pick (B_pad, tile_b, num_tiles).

    - Batch is padded only to a multiple of 128 (plus at most 127 rows per tile
      to make tile_b divide B_pad), never to a full max_tile multiple.
    - max_tile = 8192 keeps VMEM well under the v5e 16 MiB scoped default and
      the v7x 32/64 MiB caps (s/a/out tiles + hidden intermediate ~ 5 MiB).
    - Prefer >= 2 tiles when the batch allows, so v7x's two TensorCores both
      get work under "parallel" grid semantics.
    """
    B_pad = _round_up(B, 128)
    if tile_b is not None:
        tile_b = _round_up(tile_b, 128)
        num_tiles = pl.cdiv(B_pad, tile_b)
    else:
        min_tiles = 2 if B_pad >= 256 else 1
        num_tiles = max(min_tiles, pl.cdiv(B_pad, max_tile))
        tile_b = _round_up(pl.cdiv(B_pad, num_tiles), 128)
    B_pad = tile_b * num_tiles
    return B_pad, tile_b, num_tiles


# ---------------------------------------------------------------------------
# Forward
# ---------------------------------------------------------------------------
@functools.partial(jax.jit, static_argnames=("tile_b", "use_bf16"))
def critic_forward(s, a, prepared_params, tile_b=None, use_bf16=False):
    """s: [B, state_dim] f32, a: [B, action_dim] f32 -> q: [B, 1] f32.

    `prepared_params` must come from prepare_critic_params().
    """
    w1p, w2p, b12, woc, bo2 = prepared_params
    B = s.shape[0]
    S = s.shape[1]
    A = a.shape[1]
    H_pad = w1p.shape[1]

    act_dtype = jnp.bfloat16 if use_bf16 else jnp.float32
    s = s.astype(act_dtype)
    a = a.astype(act_dtype)
    w1p = w1p.astype(act_dtype)
    w2p = w2p.astype(act_dtype)

    B_pad, tile_b, num_tiles = _choose_tiling(B, tile_b)
    if B_pad != B:
        s = jnp.pad(s, ((0, B_pad - B), (0, 0)))
        a = jnp.pad(a, ((0, B_pad - B), (0, 0)))

    out = pl.pallas_call(
        critic_kernel,
        out_shape=jax.ShapeDtypeStruct((B_pad, 1), jnp.float32),
        grid=(num_tiles,),
        in_specs=[
            pl.BlockSpec((tile_b, S), lambda i: (i, 0)),   # streamed state tiles
            pl.BlockSpec((tile_b, A), lambda i: (i, 0)),   # streamed action tiles
            pl.BlockSpec((S, H_pad), lambda i: (0, 0)),    # resident weight 1
            pl.BlockSpec((A, H_pad), lambda i: (0, 0)),    # resident weight 2
            pl.BlockSpec((1, H_pad), lambda i: (0, 0)),    # resident fused bias
            pl.BlockSpec((H_pad, 1), lambda i: (0, 0)),    # resident output column
            pl.BlockSpec((1, 1), lambda i: (0, 0)),        # resident output bias
        ],
        out_specs=pl.BlockSpec((tile_b, 1), lambda i: (i, 0)),
        compiler_params=pltpu.CompilerParams(
            dimension_semantics=("parallel",)),
    )(s, a, w1p, w2p, b12, woc, bo2)

    # Drop batch padding rows.
    return out[:B]


# ---------------------------------------------------------------------------
# Init (mirrors the PyTorch module's __init__) + pure-JAX reference
# ---------------------------------------------------------------------------
def init_params(key, state_dim, action_dim, n_layer=30):
    k1, k2, k3, k4 = jax.random.split(key, 4)
    # layer_1: weight ~ N(0, 0.1), bias = 0.1   (stored as [in, out])
    w1 = jax.random.normal(k1, (state_dim, n_layer), jnp.float32) * 0.1
    b1 = jnp.full((1, n_layer), 0.1, jnp.float32)
    # layer_2: weight ~ N(0, 0.1), bias = 0.1
    w2 = jax.random.normal(k2, (action_dim, n_layer), jnp.float32) * 0.1
    b2 = jnp.full((1, n_layer), 0.1, jnp.float32)
    # output: PyTorch default init: U(-1/sqrt(fan_in), 1/sqrt(fan_in))
    bound = 1.0 / jnp.sqrt(jnp.float32(n_layer))
    wo = jax.random.uniform(k3, (n_layer, 1), jnp.float32, -bound, bound)
    bo = jax.random.uniform(k4, (1, 1), jnp.float32, -bound, bound)
    return (w1, b1, w2, b2, wo, bo)


def critic_reference(s, a, params):
    w1, b1, w2, b2, wo, bo = params
    h = jnp.maximum((s @ w1 + b1) + (a @ w2 + b2), 0.0)
    return h @ wo + bo


if __name__ == "__main__":
    key = jax.random.PRNGKey(0)
    k_s, k_a, k_p = jax.random.split(key, 3)

    batch, state_dim, action_dim = 8, 16, 8
    s = jax.random.normal(k_s, (batch, state_dim), jnp.float32)
    a = jax.random.normal(k_a, (batch, action_dim), jnp.float32)

    params = init_params(k_p, state_dim, action_dim)
    prepared = prepare_critic_params(params)   # done once, reused every forward

    q = critic_forward(s, a, prepared)
    q = jax.block_until_ready(q)

    q_ref = critic_reference(s, a, params)
    assert q.shape == (batch, 1), q.shape
    assert jnp.allclose(q, q_ref, atol=1e-4, rtol=1e-4), "mismatch vs reference"

    print("KERNEL_OK")
</pallas_src>

<mosaic_0001>
module attributes {stable_mosaic.version = 11 : i64} {
  func.func @critic_kernel(%arg0: i32, %arg1: memref<128x16xf32, #tpu.memory_space<vmem>>, %arg2: memref<128x8xf32, #tpu.memory_space<vmem>>, %arg3: memref<16x128xf32, #tpu.memory_space<vmem>>, %arg4: memref<8x128xf32, #tpu.memory_space<vmem>>, %arg5: memref<1x128xf32, #tpu.memory_space<vmem>>, %arg6: memref<128x1xf32, #tpu.memory_space<vmem>>, %arg7: memref<1x1xf32, #tpu.memory_space<vmem>>, %arg8: memref<128x1xf32, #tpu.memory_space<vmem>>) attributes {dimension_semantics = [#tpu.dimension_semantics<parallel>], iteration_bounds = array<i64: 1>, scalar_prefetch = 0 : i64, scratch_operands = 0 : i64, tpu.core_type = #tpu.core_type<tc>, window_params = [{transform_indices = @transform_0, window_bounds = array<i64: 128, 16>}, {transform_indices = @transform_1, window_bounds = array<i64: 128, 8>}, {pipeline_mode = #tpu.pipeline_mode<synchronous>, transform_indices = @transform_2, window_bounds = array<i64: 16, 128>}, {pipeline_mode = #tpu.pipeline_mode<synchronous>, transform_indices = @transform_3, window_bounds = array<i64: 8, 128>}, {pipeline_mode = #tpu.pipeline_mode<synchronous>, transform_indices = @transform_4, window_bounds = array<i64: 1, 128>}, {pipeline_mode = #tpu.pipeline_mode<synchronous>, transform_indices = @transform_5, window_bounds = array<i64: 128, 1>}, {pipeline_mode = #tpu.pipeline_mode<synchronous>, transform_indices = @transform_6, window_bounds = array<i64: 1, 1>}, {transform_indices = @transform_7, window_bounds = array<i64: 128, 1>}]} {
    %c0 = arith.constant 0 : index
    %c0_0 = arith.constant 0 : index
    %0 = vector.load %arg1[%c0, %c0_0] : memref<128x16xf32, #tpu.memory_space<vmem>>, vector<128x16xf32>
    %c0_1 = arith.constant 0 : index
    %c0_2 = arith.constant 0 : index
    %1 = vector.load %arg3[%c0_1, %c0_2] : memref<16x128xf32, #tpu.memory_space<vmem>>, vector<16x128xf32>
    %cst = arith.constant dense<0.000000e+00> : vector<128x128xf32>
    %2 = tpu.matmul %0, %1, %cst {dimension_numbers = #tpu.dot_dimension_numbers<[1], [0], [0], [1], [0, 0, 1, 1], [], []>} : vector<128x16xf32>, vector<16x128xf32>, vector<128x128xf32> -> vector<128x128xf32>
    %c0_3 = arith.constant 0 : index
    %c0_4 = arith.constant 0 : index
    %3 = vector.load %arg2[%c0_3, %c0_4] : memref<128x8xf32, #tpu.memory_space<vmem>>, vector<128x8xf32>
    %c0_5 = arith.constant 0 : index
    %c0_6 = arith.constant 0 : index
    %4 = vector.load %arg4[%c0_5, %c0_6] : memref<8x128xf32, #tpu.memory_space<vmem>>, vector<8x128xf32>
    %cst_7 = arith.constant dense<0.000000e+00> : vector<128x128xf32>
    %5 = tpu.matmul %3, %4, %cst_7 {dimension_numbers = #tpu.dot_dimension_numbers<[1], [0], [0], [1], [0, 0, 1, 1], [], []>} : vector<128x8xf32>, vector<8x128xf32>, vector<128x128xf32> -> vector<128x128xf32>
    %6 = arith.addf %2, %5 : vector<128x128xf32>
    %c0_8 = arith.constant 0 : index
    %c0_9 = arith.constant 0 : index
    %7 = vector.load %arg5[%c0_8, %c0_9] : memref<1x128xf32, #tpu.memory_space<vmem>>, vector<1x128xf32>
    %8 = vector.broadcast %7 : vector<1x128xf32> to vector<128x128xf32>
    %9 = arith.addf %6, %8 : vector<128x128xf32>
    %cst_10 = arith.constant 0.000000e+00 : f32
    %10 = vector.broadcast %cst_10 : f32 to vector<128x128xf32>
    %11 = arith.maximumf %9, %10 : vector<128x128xf32>
    %c0_11 = arith.constant 0 : index
    %c0_12 = arith.constant 0 : index
    %12 = vector.load %arg6[%c0_11, %c0_12] : memref<128x1xf32, #tpu.memory_space<vmem>>, vector<128x1xf32>
    %cst_13 = arith.constant dense<0.000000e+00> : vector<128x1xf32>
    %13 = tpu.matmul %11, %12, %cst_13 {dimension_numbers = #tpu.dot_dimension_numbers<[1], [0], [0], [1], [0, 0, 1, 1], [], []>} : vector<128x128xf32>, vector<128x1xf32>, vector<128x1xf32> -> vector<128x1xf32>
    %c0_14 = arith.constant 0 : index
    %c0_15 = arith.constant 0 : index
    %14 = vector.load %arg7[%c0_14, %c0_15] : memref<1x1xf32, #tpu.memory_space<vmem>>, vector<1x1xf32>
    %15 = vector.broadcast %14 : vector<1x1xf32> to vector<128x1xf32>
    %16 = arith.addf %13, %15 : vector<128x1xf32>
    %c0_16 = arith.constant 0 : index
    %c0_17 = arith.constant 0 : index
    %17 = vector.load %arg8[%c0_16, %c0_17] : memref<128x1xf32, #tpu.memory_space<vmem>>, vector<128x1xf32>
    tpu.vector_store %arg8[%c0_16, %c0_17], %16 {strides = array<i32>} : memref<128x1xf32, #tpu.memory_space<vmem>>, vector<128x1xf32>,
    return
  }
  func.func @transform_0(%arg0: i32) -> (i32, i32) {
    %c0_i32 = arith.constant 0 : i32
    %c0_i32_0 = arith.constant 0 : i32
    return %arg0, %c0_i32 : i32, i32
  }
  func.func @transform_1(%arg0: i32) -> (i32, i32) {
    %c0_i32 = arith.constant 0 : i32
    %c0_i32_0 = arith.constant 0 : i32
    return %arg0, %c0_i32 : i32, i32
  }
  func.func @transform_2(%arg0: i32) -> (i32, i32) {
    %c0_i32 = arith.constant 0 : i32
    %c0_i32_0 = arith.constant 0 : i32
    %c0_i32_1 = arith.constant 0 : i32
    return %c0_i32, %c0_i32_0 : i32, i32
  }
  func.func @transform_3(%arg0: i32) -> (i32, i32) {
    %c0_i32 = arith.constant 0 : i32
    %c0_i32_0 = arith.constant 0 : i32
    %c0_i32_1 = arith.constant 0 : i32
    return %c0_i32, %c0_i32_0 : i32, i32
  }
  func.func @transform_4(%arg0: i32) -> (i32, i32) {
    %c0_i32 = arith.constant 0 : i32
    %c0_i32_0 = arith.constant 0 : i32
    %c0_i32_1 = arith.constant 0 : i32
    return %c0_i32, %c0_i32_0 : i32, i32
  }
  func.func @transform_5(%arg0: i32) -> (i32, i32) {
    %c0_i32 = arith.constant 0 : i32
    %c0_i32_0 = arith.constant 0 : i32
    %c0_i32_1 = arith.constant 0 : i32
    return %c0_i32, %c0_i32_0 : i32, i32
  }
  func.func @transform_6(%arg0: i32) -> (i32, i32) {
    %c0_i32 = arith.constant 0 : i32
    %c0_i32_0 = arith.constant 0 : i32
    %c0_i32_1 = arith.constant 0 : i32
    return %c0_i32, %c0_i32_0 : i32, i32
  }
  func.func @transform_7(%arg0: i32) -> (i32, i32) {
    %c0_i32 = arith.constant 0 : i32
    %c0_i32_0 = arith.constant 0 : i32
    return %arg0, %c0_i32 : i32, i32
  }
}

</mosaic_0001>

<bundles_post_ra>
// kernel: critic_forward.1
= control target key start
LH: loop header
LB: loop body
LE: loop exit
PB: predicated region body
PF: predicated region fallthrough
CT: control target
= control target key end

     0   :  { %vm63_vm0 = vcmask 64512   ;;  %vm257_vm1 = vcmask 130048   ;;  %vm658_vm2 = vcmask 7168   ;;  %s1237_s3 = inlined_call_operand.vmem [shape: f32[8,128], index: 3, kind: input, shape index: {}]   ;;  %s1238_s1 = inlined_call_operand.vmem [shape: f32[128,8], index: 1, kind: input, shape index: {}]   ;;  %s1239_s2 = inlined_call_operand.vmem [shape: f32[16,128], index: 2, kind: input, shape index: {}]   ;;  %s1240_s5 = inlined_call_operand.vmem [shape: f32[128,1], index: 5, kind: input, shape index: {}]   ;;  %s1241_s0 = inlined_call_operand.vmem [shape: f32[128,16], index: 0, kind: input, shape index: {}]   ;;  %s1242_s6 = inlined_call_operand.<no memory space> [shape: f32[1,1], index: 6, kind: input, shape index: {}]   ;;  %s1243_s4 = inlined_call_operand.vmem [shape: f32[1,128], index: 4, kind: input, shape index: {}]   ;;  %s1244_s7 = inlined_call_operand.vmem [shape: f32[128,1], index: 7, kind: output, shape index: {}]  }
   0x1   :  { %v62_v0 = vld [vmem:[%s1237_s3] sm:$0xff]  ;;  %v47_v2 = vld [vmem:[%s1238_s1 + $0x8] sm:$0xff]  ;;  %v48_v5 = vld [vmem:[%s1238_s1 + $0x10] sm:$0xff]  ;;  %v12_v60 = vstv %s1242_s6 }
   0x2   :  { %v46_v1 = vld [vmem:[%s1238_s1] sm:$0xff]  ;;  %780 = vmatprep.subr.mxu0 %v62_v0  ;;  %v45_v4 = vld [vmem:[%s1239_s2 + $0x8] sm:$0xff]  ;;  %v49_v7 = vld [vmem:[%s1238_s1 + $0x18] sm:$0xff]  ;;  %13 = vst [vmem:[#allocation2] sm:$0x1] %v12_v60 }
   0x3   :  { %782 = vmatprep.mubr.msk.f32.mxu0 %vm63_vm0, %v46_v1  ;;  %v44_v3 = vld [vmem:[%s1239_s2] sm:$0xff]  ;;  %781 = vmatpush3.msra.mxu0 %v62_v0  ;;  %v51_v9 = vld [vmem:[%s1238_s1 + $0x28] sm:$0xff]  ;;  %v52_v10 = vld [vmem:[%s1238_s1 + $0x30] sm:$0xff] }
   0x4   :  { %v890_v6 = vpack.c.bf16 %v45_v4, %v44_v3  ;;  %783 = vmatmul.mubr.msk.f32.vlgmr.msra.gmra.mrb[0].mxu0 %vm63_vm0, %v47_v2  ;;  %v50_v8 = vld [vmem:[%s1238_s1 + $0x20] sm:$0xff]  ;;  %v53_v11 = vld [vmem:[%s1238_s1 + $0x38] sm:$0xff]  ;;  %v491_v13 = vld [vmem:[%s1240_s5 + $0x8] sm:$0xff] }
   0x5   :  { %785 = vmatprep.mubr.msk.f32.mxu0 %vm63_vm0, %v48_v5  ;;  %v490_v12 = vld [vmem:[%s1240_s5] sm:$0xff]  ;;  %v492_v14 = vld [vmem:[%s1240_s5 + $0x10] sm:$0xff]  ;;  %v493_v15 = vld [vmem:[%s1240_s5 + $0x18] sm:$0xff] }
   0x6   :  { %891 = vmatprep.subr.bf16.mxu0 %v890_v6  ;;  %v54_v16 = vld [vmem:[%s1238_s1 + $0x40] sm:$0xff]  ;;  %v894_v17 = vpack.c.bf16 %v491_v13, %v490_v12  ;;  %v898_v18 = vpack.c.bf16 %v493_v15, %v492_v14  ;;  %v495_v20 = vld [vmem:[%s1240_s5 + $0x28] sm:$0xff]  ;;  %v56_v22 = vld [vmem:[%s1238_s1 + $0x50] sm:$0xff] }
   0x7   :  { %893 = vmatpush3.bf16.msra.mxu0 %v890_v6  ;;  %v494_v19 = vld [vmem:[%s1240_s5 + $0x20] sm:$0xff]  ;;  %v55_v21 = vld [vmem:[%s1238_s1 + $0x48] sm:$0xff]  ;;  %v496_v24 = vld [vmem:[%s1240_s5 + $0x30] sm:$0xff] }
   0x8   :  { %786 = vmatmul.mubr.msk.f32.gmra.mrb[2].mxu0 %vm63_vm0, %v49_v7  ;;  %895 = vmatprep.subr.bf16.mxu1 %v894_v17  ;;  %v902_v23 = vpack.c.bf16 %v495_v20, %v494_v19  ;;  %v497_v25 = vld [vmem:[%s1240_s5 + $0x38] sm:$0xff]  ;;  %v58_v27 = vld [vmem:[%s1238_s1 + $0x60] sm:$0xff]  ;;  %v499_v30 = vld [vmem:[%s1240_s5 + $0x48] sm:$0xff] }
   0x9   :  { %788 = vmatprep.mubr.msk.f32.mxu0 %vm63_vm0, %v50_v8  ;;  %897 = vmatpush3.bf16.msra.mxu1 %v894_v17  ;;  %v57_v26 = vld [vmem:[%s1238_s1 + $0x58] sm:$0xff]  ;;  %v906_v28 = vpack.c.bf16 %v497_v25, %v496_v24  ;;  %v498_v29 = vld [vmem:[%s1240_s5 + $0x40] sm:$0xff]  ;;  %v59_v31 = vld [vmem:[%s1238_s1 + $0x68] sm:$0xff] }
   0xa   :  { %899 = vmatprep.subr.bf16.mxu1 %v898_v18  ;;  %v60_v32 = vld [vmem:[%s1238_s1 + $0x70] sm:$0xff]  ;;  %v910_v33 = vpack.c.bf16 %v499_v30, %v498_v29  ;;  %v501_v35 = vld [vmem:[%s1240_s5 + $0x58] sm:$0xff]  ;;  %v28_v37 = vld [vmem:[%s1241_s0] sm:$0xff] }
   0xb   :  { %v500_v34 = vld [vmem:[%s1240_s5 + $0x50] sm:$0xff]  ;;  %v61_v36 = vld [vmem:[%s1238_s1 + $0x78] sm:$0xff]  ;;  %v502_v39 = vld [vmem:[%s1240_s5 + $0x60] sm:$0xff] }
   0xc   :  { %789 = vmatmul.mubr.msk.f32.gmra.mrb[4].mxu0 %vm63_vm0, %v51_v9  ;;  %v914_v38 = vpack.c.bf16 %v501_v35, %v500_v34  ;;  %v503_v40 = vld [vmem:[%s1240_s5 + $0x68] sm:$0xff]  ;;  %v30_v42 = vld [vmem:[%s1241_s0 + $0x10] sm:$0xff]  ;;  %v31_v44 = vld [vmem:[%s1241_s0 + $0x18] sm:$0xff] }
   0xd   :  { %791 = vmatprep.mubr.msk.f32.mxu0 %vm63_vm0, %v52_v10  ;;  %901 = vmatpush3.bf16.msra.mxu1 %v898_v18  ;;  %v29_v41 = vld [vmem:[%s1241_s0 + $0x8] sm:$0xff]  ;;  %v918_v43 = vpack.c.bf16 %v503_v40, %v502_v39  ;;  %v32_v45 = vld [vmem:[%s1241_s0 + $0x20] sm:$0xff]  ;;  %v34_v47 = vld [vmem:[%s1241_s0 + $0x30] sm:$0xff] }
   0xe   :  { %903 = vmatprep.subr.bf16.mxu1 %v902_v23  ;;  %v33_v46 = vld [vmem:[%s1241_s0 + $0x28] sm:$0xff]  ;;  %v35_v48 = vld [vmem:[%s1241_s0 + $0x38] sm:$0xff]  ;;  %v36_v49 = vld [vmem:[%s1241_s0 + $0x40] sm:$0xff] }
   0xf   :  { %v37_v50 = vld [vmem:[%s1241_s0 + $0x48] sm:$0xff]  ;;  %v38_v51 = vld [vmem:[%s1241_s0 + $0x50] sm:$0xff]  ;;  %v39_v52 = vld [vmem:[%s1241_s0 + $0x58] sm:$0xff] }
  0x10   :  { %792 = vmatmul.mubr.msk.f32.gmra.mrb[6].mxu0 %vm63_vm0, %v53_v11  ;;  %v40_v53 = vld [vmem:[%s1241_s0 + $0x60] sm:$0xff]  ;;  %v41_v54 = vld [vmem:[%s1241_s0 + $0x68] sm:$0xff]  ;;  %v42_v55 = vld [vmem:[%s1241_s0 + $0x70] sm:$0xff] }
  0x11   :  { %794 = vmatprep.mubr.msk.f32.mxu0 %vm63_vm0, %v54_v16  ;;  %905 = vmatpush3.bf16.msra.mxu1 %v902_v23  ;;  %v43_v56 = vld [vmem:[%s1241_s0 + $0x78] sm:$0xff]  ;;  %v504_v57 = vld [vmem:[%s1240_s5 + $0x70] sm:$0xff]  ;;  %v711_v61 = vld [vmem:[%s1243_s4] ss:$0 sm:$0xff] }
  0x12   :  { %907 = vmatprep.subr.bf16.mxu1 %v906_v28  ;;  %v505_v58 = vld [vmem:[%s1240_s5 + $0x78] sm:$0xff] }
  0x13   :  { %v922_v59 = vpack.c.bf16 %v505_v58, %v504_v57 }
  0x14   :  { %795 = vmatmul.mubr.msk.f32.gmra.mrb[8].mxu0 %vm63_vm0, %v55_v21 }
  0x15   :  { %797 = vmatprep.mubr.msk.f32.mxu0 %vm63_vm0, %v56_v22  ;;  %909 = vmatpush3.bf16.msra.mxu1 %v906_v28 }
  0x16   :  { %911 = vmatprep.subr.bf16.mxu1 %v910_v33 }
  0x18   :  { %798 = vmatmul.mubr.msk.f32.gmra.mrb[10].mxu0 %vm63_vm0, %v57_v26 }
  0x19   :  { %800 = vmatprep.mubr.msk.f32.mxu0 %vm63_vm0, %v58_v27  ;;  %913 = vmatpush3.bf16.msra.mxu1 %v910_v33 }
  0x1a   :  { %915 = vmatprep.subr.bf16.mxu1 %v914_v38 }
  0x1c   :  { %801 = vmatmul.mubr.msk.f32.gmra.mrb[12].mxu0 %vm63_vm0, %v59_v31 }
  0x1d   :  { %803 = vmatprep.mubr.msk.f32.mxu0 %vm63_vm0, %v60_v32  ;;  %917 = vmatpush3.bf16.msra.mxu1 %v914_v38 }
  0x1e   :  { %919 = vmatprep.subr.bf16.mxu1 %v918_v43 }
  0x20   :  { %804 = vmatmul.mubr.msk.f32.gmra.mrb[14].mxu0 %vm63_vm0, %v61_v36 }
  0x21   :  { %810 = vmatprep.mubr.msk.f32.mxu0 %vm257_vm1, %v28_v37  ;;  %921 = vmatpush3.bf16.msra.mxu1 %v918_v43 }
  0x22   :  { %923 = vmatprep.subr.bf16.mxu1 %v922_v59 }
  0x24   :  { %811 = vmatmul.mubr.msk.f32.vlgmr.msra.gmra.mrb[0].mxu0 %vm257_vm1, %v29_v41 }
  0x25   :  { %813 = vmatprep.mubr.msk.f32.mxu0 %vm257_vm1, %v30_v42  ;;  %925 = vmatpush3.bf16.msra.mxu1 %v922_v59 }
  0x28   :  { %814 = vmatmul.mubr.msk.f32.gmra.mrb[2].mxu0 %vm257_vm1, %v31_v44 }
  0x29   :  { %816 = vmatprep.mubr.msk.f32.mxu0 %vm257_vm1, %v32_v45 }
  0x2c   :  { %817 = vmatmul.mubr.msk.f32.gmra.mrb[4].mxu0 %vm257_vm1, %v33_v46  ;;  %v712_v46 = vld [vmem:[#allocation2] ss:$0 sm:$0xff] }
  0x2d   :  { %819 = vmatprep.mubr.msk.f32.mxu0 %vm257_vm1, %v34_v47 }
  0x30   :  { %820 = vmatmul.mubr.msk.f32.gmra.mrb[6].mxu0 %vm257_vm1, %v35_v48 }
  0x31   :  { %822 = vmatprep.mubr.msk.f32.mxu0 %vm257_vm1, %v36_v49 }
  0x34   :  { %823 = vmatmul.mubr.msk.f32.gmra.mrb[8].mxu0 %vm257_vm1, %v37_v50 }
  0x35   :  { %825 = vmatprep.mubr.msk.f32.mxu0 %vm257_vm1, %v38_v51 }
  0x38   :  { %826 = vmatmul.mubr.msk.f32.gmra.mrb[10].mxu0 %vm257_vm1, %v39_v52 }
  0x39   :  { %828 = vmatprep.mubr.msk.f32.mxu0 %vm257_vm1, %v40_v53 }
  0x3c   :  { %829 = vmatmul.mubr.msk.f32.gmra.mrb[12].mxu0 %vm257_vm1, %v41_v54 }
  0x3d   :  { %831 = vmatprep.mubr.msk.f32.mxu0 %vm257_vm1, %v42_v55 }
  0x40   :  { %832 = vmatmul.mubr.msk.f32.gmra.mrb[14].mxu0 %vm257_vm1, %v43_v56 }
  0xf7   :  { %v812_v62 = vpop.f32.mrb[0].mxu0 }
  0xf8   :  { %v459_v63 = vadd.f32 %v812_v62, %v711_v61  ;;  %v372_v0 = vpop.f32.mrb[1].mxu0 }
  0xf9   :  { %v458_v1 = vadd.f32 %v711_v61, %v372_v0 }
  0xfa   :  { %v475_v4 = vmax.f32 %v459_v63, 0.0 }
  0xfb   :  { %v815_v2 = vpop.f32.mrb[2].mxu0  ;;  %v474_v3 = vmax.f32 %v458_v1, 0.0 }
  0xfc   :  { %v461_v5 = vadd.f32 %v815_v2, %v711_v61  ;;  %v382_v6 = vpop.f32.mrb[3].mxu0 }
  0xfd   :  { %v460_v7 = vadd.f32 %v711_v61, %v382_v6  ;;  %866 = vmatprep.mubr.f32.mxu1 %v474_v3 }
  0xfe   :  { %867 = vmatmul.mubr.f32.vlgmr.msra.gmra.mrb[0].mxu1 %v475_v4  ;;  %v477_v10 = vmax.f32 %v461_v5, 0.0 }
  0xff   :  { %v476_v8 = vmax.f32 %v460_v7, 0.0  ;;  %v818_v9 = vpop.f32.mrb[4].mxu0 }
 0x100   :  { %v463_v11 = vadd.f32 %v818_v9, %v711_v61  ;;  %v392_v12 = vpop.f32.mrb[5].mxu0 }
 0x101   :  { %v462_v13 = vadd.f32 %v711_v61, %v392_v12  ;;  %869 = vmatprep.mubr.f32.mxu1 %v476_v8 }
 0x102   :  { %870 = vmatmul.mubr.f32.gmra.mrb[2].mxu1 %v477_v10  ;;  %v479_v16 = vmax.f32 %v463_v11, 0.0 }
 0x103   :  { %v478_v14 = vmax.f32 %v462_v13, 0.0  ;;  %v821_v15 = vpop.f32.mrb[6].mxu0 }
 0x104   :  { %v465_v17 = vadd.f32 %v821_v15, %v711_v61  ;;  %v402_v18 = vpop.f32.mrb[7].mxu0 }
 0x105   :  { %v464_v19 = vadd.f32 %v711_v61, %v402_v18  ;;  %872 = vmatprep.mubr.f32.mxu1 %v478_v14 }
 0x106   :  { %873 = vmatmul.mubr.f32.gmra.mrb[4].mxu1 %v479_v16  ;;  %v481_v22 = vmax.f32 %v465_v17, 0.0 }
 0x107   :  { %v480_v20 = vmax.f32 %v464_v19, 0.0  ;;  %v824_v21 = vpop.f32.mrb[8].mxu0 }
 0x108   :  { %v467_v23 = vadd.f32 %v824_v21, %v711_v61  ;;  %v412_v24 = vpop.f32.mrb[9].mxu0 }
 0x109   :  { %v466_v25 = vadd.f32 %v711_v61, %v412_v24  ;;  %875 = vmatprep.mubr.f32.mxu1 %v480_v20 }
 0x10a   :  { %876 = vmatmul.mubr.f32.gmra.mrb[6].mxu1 %v481_v22  ;;  %v483_v28 = vmax.f32 %v467_v23, 0.0 }
 0x10b   :  { %v482_v26 = vmax.f32 %v466_v25, 0.0  ;;  %v827_v27 = vpop.f32.mrb[10].mxu0 }
 0x10c   :  { %v469_v29 = vadd.f32 %v827_v27, %v711_v61  ;;  %v422_v30 = vpop.f32.mrb[11].mxu0 }
 0x10d   :  { %v468_v31 = vadd.f32 %v711_v61, %v422_v30  ;;  %878 = vmatprep.mubr.f32.mxu1 %v482_v26 }
 0x10e   :  { %879 = vmatmul.mubr.f32.gmra.mrb[8].mxu1 %v483_v28  ;;  %v485_v34 = vmax.f32 %v469_v29, 0.0 }
 0x10f   :  { %v484_v32 = vmax.f32 %v468_v31, 0.0  ;;  %v830_v33 = vpop.f32.mrb[12].mxu0 }
 0x110   :  { %v471_v35 = vadd.f32 %v830_v33, %v711_v61  ;;  %v432_v36 = vpop.f32.mrb[13].mxu0 }
 0x111   :  { %v470_v37 = vadd.f32 %v711_v61, %v432_v36  ;;  %881 = vmatprep.mubr.f32.mxu1 %v484_v32 }
 0x112   :  { %882 = vmatmul.mubr.f32.gmra.mrb[10].mxu1 %v485_v34  ;;  %v487_v40 = vmax.f32 %v471_v35, 0.0 }
 0x113   :  { %v486_v38 = vmax.f32 %v470_v37, 0.0  ;;  %v833_v39 = vpop.f32.mrb[14].mxu0 }
 0x114   :  { %v473_v41 = vadd.f32 %v833_v39, %v711_v61  ;;  %v442_v42 = vpop.f32.mrb[15].mxu0 }
 0x115   :  { %v472_v43 = vadd.f32 %v711_v61, %v442_v42  ;;  %884 = vmatprep.mubr.f32.mxu1 %v486_v38 }
 0x116   :  { %885 = vmatmul.mubr.f32.gmra.mrb[12].mxu1 %v487_v40  ;;  %v489_v45 = vmax.f32 %v473_v41, 0.0 }
 0x117   :  { %v488_v44 = vmax.f32 %v472_v43, 0.0 }
 0x119   :  { %887 = vmatprep.mubr.f32.mxu1 %v488_v44 }
 0x11a   :  { %888 = vmatmul.mubr.f32.gmra.mrb[14].mxu1 %v489_v45 }
 0x1d1   :  { %v868_v47 = vpop.f32.mrb[0].mxu1 }
 0x1d2   :  { %v585_v48 = vadd.f32 %v868_v47, %v712_v46  ;;  %v579_v49 = vpop.f32.mrb[1].mxu1 }
 0x1d3   :  { %v580_v50 = vadd.f32 %v712_v46, %v579_v49 }
 0x1d4   :  { %660 = vst.msk [vmem:[%s1244_s7 + $0x8] sm:$0xff] %vm658_vm2, %v585_v48 }
 0x1d5   :  { %659 = vst.msk [vmem:[%s1244_s7] sm:$0xff] %vm658_vm2, %v580_v50  ;;  %v871_v51 = vpop.f32.mrb[2].mxu1 }
 0x1d6   :  { %v595_v52 = vadd.f32 %v871_v51, %v712_v46  ;;  %v589_v53 = vpop.f32.mrb[3].mxu1 }
 0x1d7   :  { %v590_v54 = vadd.f32 %v712_v46, %v589_v53 }
 0x1d8   :  { %662 = vst.msk [vmem:[%s1244_s7 + $0x18] sm:$0xff] %vm658_vm2, %v595_v52 }
 0x1d9   :  { %661 = vst.msk [vmem:[%s1244_s7 + $0x10] sm:$0xff] %vm658_vm2, %v590_v54  ;;  %v874_v55 = vpop.f32.mrb[4].mxu1 }
 0x1da   :  { %v605_v56 = vadd.f32 %v874_v55, %v712_v46  ;;  %v599_v57 = vpop.f32.mrb[5].mxu1 }
 0x1db   :  { %v600_v58 = vadd.f32 %v712_v46, %v599_v57 }
 0x1dc   :  { %664 = vst.msk [vmem:[%s1244_s7 + $0x28] sm:$0xff] %vm658_vm2, %v605_v56 }
 0x1dd   :  { %663 = vst.msk [vmem:[%s1244_s7 + $0x20] sm:$0xff] %vm658_vm2, %v600_v58  ;;  %v877_v59 = vpop.f32.mrb[6].mxu1 }
 0x1de   :  { %v615_v60 = vadd.f32 %v877_v59, %v712_v46  ;;  %v609_v61 = vpop.f32.mrb[7].mxu1 }
 0x1df   :  { %v610_v62 = vadd.f32 %v712_v46, %v609_v61 }
 0x1e0   :  { %666 = vst.msk [vmem:[%s1244_s7 + $0x38] sm:$0xff] %vm658_vm2, %v615_v60 }
 0x1e1   :  { %665 = vst.msk [vmem:[%s1244_s7 + $0x30] sm:$0xff] %vm658_vm2, %v610_v62  ;;  %v880_v63 = vpop.f32.mrb[8].mxu1 }
 0x1e2   :  { %v625_v0 = vadd.f32 %v880_v63, %v712_v46  ;;  %v619_v1 = vpop.f32.mrb[9].mxu1 }
 0x1e3   :  { %v620_v2 = vadd.f32 %v712_v46, %v619_v1 }
 0x1e4   :  { %668 = vst.msk [vmem:[%s1244_s7 + $0x48] sm:$0xff] %vm658_vm2, %v625_v0 }
 0x1e5   :  { %667 = vst.msk [vmem:[%s1244_s7 + $0x40] sm:$0xff] %vm658_vm2, %v620_v2  ;;  %v883_v3 = vpop.f32.mrb[10].mxu1 }
 0x1e6   :  { %v635_v4 = vadd.f32 %v883_v3, %v712_v46  ;;  %v629_v5 = vpop.f32.mrb[11].mxu1 }
 0x1e7   :  { %v630_v6 = vadd.f32 %v712_v46, %v629_v5 }
 0x1e8   :  { %670 = vst.msk [vmem:[%s1244_s7 + $0x58] sm:$0xff] %vm658_vm2, %v635_v4 }
 0x1e9   :  { %669 = vst.msk [vmem:[%s1244_s7 + $0x50] sm:$0xff] %vm658_vm2, %v630_v6  ;;  %v886_v7 = vpop.f32.mrb[12].mxu1 }
 0x1ea   :  { %v645_v8 = vadd.f32 %v886_v7, %v712_v46  ;;  %v639_v9 = vpop.f32.mrb[13].mxu1 }
 0x1eb   :  { %v640_v10 = vadd.f32 %v712_v46, %v639_v9 }
 0x1ec   :  { %672 = vst.msk [vmem:[%s1244_s7 + $0x68] sm:$0xff] %vm658_vm2, %v645_v8 }
 0x1ed   :  { %671 = vst.msk [vmem:[%s1244_s7 + $0x60] sm:$0xff] %vm658_vm2, %v640_v10  ;;  %v889_v11 = vpop.f32.mrb[14].mxu1 }
 0x1ee   :  { %v655_v12 = vadd.f32 %v889_v11, %v712_v46  ;;  %v649_v13 = vpop.f32.mrb[15].mxu1 }
 0x1ef   :  { %v650_v14 = vadd.f32 %v712_v46, %v649_v13 }
 0x1f0   :  { %674 = vst.msk [vmem:[%s1244_s7 + $0x78] sm:$0xff] %vm658_vm2, %v655_v12 }
 0x1f1   :  { %673 = vst.msk [vmem:[%s1244_s7 + $0x70] sm:$0xff] %vm658_vm2, %v650_v14 }

</bundles_post_ra>
